<compile_context>
chip_gen: v5e
topology: v5e:2x2
jax: 0.10.0
libtpu: 0.0.40
codegen_flags: <defaults>
</compile_context>

<pallas_src>
import jax
import jax.numpy as jnp
from jax.experimental import pallas as pl
from jax.experimental.pallas import tpu as pltpu


# --------------------------------------------------------------------------
# Kernel
# --------------------------------------------------------------------------
def gbdt_dense_kernel(idx_ref, cw1_ref, b1_ref, w2_ref, b2_ref, w3_ref,
                      b3_ref, out_ref):
    """Per-batch-tile fused GBDT2NN forward.

    idx_ref : (TB, F)        int32 feature ids (into the shared embed table)
    cw1_ref : (F, Vp, N1p)   f32   per-field  embed_table @ W1_field  (fused)
    b1_ref  : (1, N1p)       f32
    w2_ref  : (N1p, N2p)     f32   block-diagonal over groups
    b2_ref  : (1, N2p)       f32
    w3_ref  : (N2p, G)       f32   block-diagonal over groups
    b3_ref  : (1, G)         f32
    out_ref : (TB, G)        f32
    """
    tb = idx_ref.shape[0]
    num_field, vp, n1p = cw1_ref.shape

    idx = idx_ref[...]                                            # (TB, F)
    lane_ids = jax.lax.broadcasted_iota(jnp.int32, (tb, vp), 1)   # (TB, Vp)

    # Layer 1 (fused embedding gather + linear):  h1 = sum_f onehot_f @ cw1[f]
    # F is small & static -> unrolled; each matmul is well shaped (K=Vp, N=N1p).
    h1 = jnp.zeros((tb, n1p), jnp.float32)
    for f in range(num_field):
        onehot = (idx[:, f:f + 1] == lane_ids).astype(jnp.float32)  # (TB, Vp)
        h1 = h1 + jnp.dot(onehot, cw1_ref[f],
                          preferred_element_type=jnp.float32)
    h1 = jnp.maximum(h1 + b1_ref[...], 0.0)          # relu(lin1)
    # dropout(0.1) -> identity (eval semantics)

    # Layer 2 (block-diagonal over groups, padded lanes are exact zeros).
    h2 = jnp.dot(h1, w2_ref[...], preferred_element_type=jnp.float32)
    h2 = jnp.maximum(h2 + b2_ref[...], 0.0)          # relu(lin2)
    # dropout(0.1) -> identity (eval semantics)

    # Layer 3 -> (TB, G) directly (== torch.cat(list1, 1)).
    out = jnp.dot(h2, w3_ref[...], preferred_element_type=jnp.float32)
    out_ref[...] = out + b3_ref[...]


# --------------------------------------------------------------------------
# Wrapper / glue
# --------------------------------------------------------------------------
def _round_up(x, m):
    return ((x + m - 1) // m) * m


def _block_diag(blocks):
    rows = sum(b.shape[0] for b in blocks)
    cols = sum(b.shape[1] for b in blocks)
    out = jnp.zeros((rows, cols), jnp.float32)
    r = c = 0
    for b in blocks:
        out = out.at[r:r + b.shape[0], c:c + b.shape[1]].set(b)
        r += b.shape[0]
        c += b.shape[1]
    return out


def _pad2d(x, rows, cols):
    return jnp.pad(x, ((0, rows - x.shape[0]), (0, cols - x.shape[1])))


def gbdt_dense_forward(idx, embed_table, params, *, batch_tile=512):
    """idx: (B, field_size) int32 indices into the shared embedding table."""
    w1, b1, w2, b2, w3, b3 = params
    batch, field_size = idx.shape
    vocab, emb_dim = embed_table.shape
    num_group = w1.shape[0]

    n1 = num_group * 16
    n2 = num_group * 6
    vp = _round_up(vocab, 128)        # pad lookup rows to full lanes
    n1p = _round_up(n1, 128)          # pad fused N axes for MXU width
    n2p = _round_up(n2, 128)

    hi = jax.lax.Precision.HIGHEST

    # --- fuse embedding table into layer-1 weights, per field ---------------
    # W1: (G, F*E, 16) -> (F, E, G*16); cw1[f] = embed_table @ W1_field
    w1_f = w1.reshape(num_group, field_size, emb_dim, 16)
    w1_f = jnp.transpose(w1_f, (1, 2, 0, 3)).reshape(field_size, emb_dim, n1)
    cw1 = jnp.einsum('ve,fen->fvn', embed_table.astype(jnp.float32), w1_f,
                     precision=hi)                              # (F, V, G*16)
    cw1 = jnp.pad(cw1, ((0, 0), (0, vp - vocab), (0, n1p - n1)))

    b1_p = jnp.pad(b1.reshape(1, n1), ((0, 0), (0, n1p - n1)))
    w2_bd = _pad2d(_block_diag([w2[g] for g in range(num_group)]), n1p, n2p)
    b2_p = jnp.pad(b2.reshape(1, n2), ((0, 0), (0, n2p - n2)))
    w3_bd = _pad2d(_block_diag([w3[g] for g in range(num_group)]),
                   n2p, num_group)
    b3_p = b3.reshape(1, num_group)

    # --- batch grid ----------------------------------------------------------
    tb = min(_round_up(batch, 8), batch_tile)
    grid = (pl.cdiv(batch, tb),)

    out = pl.pallas_call(
        gbdt_dense_kernel,
        out_shape=jax.ShapeDtypeStruct((batch, num_group), jnp.float32),
        grid=grid,
        in_specs=[
            pl.BlockSpec((tb, field_size), lambda i: (i, 0)),        # idx
            pl.BlockSpec((field_size, vp, n1p), lambda i: (0, 0, 0)),  # cw1
            pl.BlockSpec((1, n1p), lambda i: (0, 0)),                # b1
            pl.BlockSpec((n1p, n2p), lambda i: (0, 0)),              # w2
            pl.BlockSpec((1, n2p), lambda i: (0, 0)),                # b2
            pl.BlockSpec((n2p, num_group), lambda i: (0, 0)),        # w3
            pl.BlockSpec((1, num_group), lambda i: (0, 0)),          # b3
        ],
        out_specs=pl.BlockSpec((tb, num_group), lambda i: (i, 0)),
        compiler_params=pltpu.CompilerParams(
            dimension_semantics=("parallel",),
            vmem_limit_bytes=32 * 1024 * 1024),
    )(idx.astype(jnp.int32), cw1, b1_p, w2_bd, b2_p, w3_bd, b3_p)
    return out


# --------------------------------------------------------------------------
# Params / reference
# --------------------------------------------------------------------------
def init_params(key, field_size, emb_dim, num_group, feat_total):
    """Deterministic synthetic init mirroring PyTorch defaults in shape."""
    d_in = field_size * emb_dim
    keys = jax.random.split(key, 8)
    embed_table = jax.random.normal(keys[0], (feat_total, emb_dim),
                                    dtype=jnp.float32)

    def lin_init(kw, kb, fan_in, fan_out):
        bound = 1.0 / jnp.sqrt(jnp.float32(fan_in))
        w = jax.random.uniform(kw, (num_group, fan_in, fan_out),
                               minval=-bound, maxval=bound, dtype=jnp.float32)
        b = jax.random.uniform(kb, (num_group, 1, fan_out),
                               minval=-bound, maxval=bound, dtype=jnp.float32)
        return w, b

    w1, b1 = lin_init(keys[1], keys[2], d_in, 16)
    w2, b2 = lin_init(keys[3], keys[4], 16, 6)
    w3, b3 = lin_init(keys[5], keys[6], 6, 1)
    return embed_table, (w1, b1, w2, b2, w3, b3)


def reference_forward(idx, embed_table, params):
    """Pure-JAX reference for sanity checking."""
    w1, b1, w2, b2, w3, b3 = params
    hi = jax.lax.Precision.HIGHEST
    batch = idx.shape[0]
    x = jnp.take(embed_table, idx, axis=0).reshape(batch, -1)
    outs = []
    for g in range(w1.shape[0]):
        h1 = jnp.maximum(jnp.dot(x, w1[g], precision=hi) + b1[g], 0.0)
        h2 = jnp.maximum(jnp.dot(h1, w2[g], precision=hi) + b2[g], 0.0)
        outs.append(jnp.dot(h2, w3[g], precision=hi) + b3[g])
    return jnp.concatenate(outs, axis=1)


# --------------------------------------------------------------------------
# Demo
# --------------------------------------------------------------------------
if __name__ == "__main__":
    field_size = 4
    embedding_size = 8
    feat_sizes = [10, 20, 30, 40]          # sum = 100 rows in embedding table
    num_group = 3
    batch = 8

    key = jax.random.PRNGKey(0)
    k_idx, k_param = jax.random.split(key)
    embed_table, params = init_params(k_param, field_size, embedding_size,
                                      num_group, sum(feat_sizes))
    idx = jax.random.randint(k_idx, (batch, field_size), 0, sum(feat_sizes),
                             dtype=jnp.int32)

    out = gbdt_dense_forward(idx, embed_table, params)
    out = jax.block_until_ready(out)

    ref = reference_forward(idx, embed_table, params)
    assert out.shape == (batch, num_group)
    assert jnp.allclose(out, ref, atol=1e-4, rtol=1e-4), (
        float(jnp.max(jnp.abs(out - ref))))
    print("KERNEL_OK")
</pallas_src>

<mosaic_0001>
module attributes {stable_mosaic.version = 11 : i64} {
  func.func @gbdt_dense_kernel(%arg0: i32, %arg1: memref<8x4xi32, #tpu.memory_space<vmem>>, %arg2: memref<4x128x128xf32, #tpu.memory_space<vmem>>, %arg3: memref<1x128xf32, #tpu.memory_space<vmem>>, %arg4: memref<128x128xf32, #tpu.memory_space<vmem>>, %arg5: memref<1x128xf32, #tpu.memory_space<vmem>>, %arg6: memref<128x3xf32, #tpu.memory_space<vmem>>, %arg7: memref<1x3xf32, #tpu.memory_space<vmem>>, %arg8: memref<8x3xf32, #tpu.memory_space<vmem>>) attributes {dimension_semantics = [#tpu.dimension_semantics<parallel>], iteration_bounds = array<i64: 1>, scalar_prefetch = 0 : i64, scratch_operands = 0 : i64, tpu.core_type = #tpu.core_type<tc>, window_params = [{transform_indices = @transform_0, window_bounds = array<i64: 8, 4>}, {pipeline_mode = #tpu.pipeline_mode<synchronous>, transform_indices = @transform_1, window_bounds = array<i64: 4, 128, 128>}, {pipeline_mode = #tpu.pipeline_mode<synchronous>, transform_indices = @transform_2, window_bounds = array<i64: 1, 128>}, {pipeline_mode = #tpu.pipeline_mode<synchronous>, transform_indices = @transform_3, window_bounds = array<i64: 128, 128>}, {pipeline_mode = #tpu.pipeline_mode<synchronous>, transform_indices = @transform_4, window_bounds = array<i64: 1, 128>}, {pipeline_mode = #tpu.pipeline_mode<synchronous>, transform_indices = @transform_5, window_bounds = array<i64: 128, 3>}, {pipeline_mode = #tpu.pipeline_mode<synchronous>, transform_indices = @transform_6, window_bounds = array<i64: 1, 3>}, {transform_indices = @transform_7, window_bounds = array<i64: 8, 3>}]} {
    %c0 = arith.constant 0 : index
    %c0_0 = arith.constant 0 : index
    %0 = vector.load %arg1[%c0, %c0_0] : memref<8x4xi32, #tpu.memory_space<vmem>>, vector<8x4xi32>
    %1 = tpu.iota {dimensions = array<i32: 1>} : vector<8x128xi32>
    %cst = arith.constant 0.000000e+00 : f32
    %2 = vector.broadcast %cst : f32 to vector<8x128xf32>
    %3 = vector.extract_strided_slice %0 {offsets = [0, 0], sizes = [8, 1], strides = [1, 1]} : vector<8x4xi32> to vector<8x1xi32>
    %4 = vector.broadcast %3 : vector<8x1xi32> to vector<8x128xi32>
    %5 = arith.cmpi eq, %4, %1 : vector<8x128xi32>
    %6 = arith.extui %5 : vector<8x128xi1> to vector<8x128xi32>
    %7 = arith.sitofp %6 : vector<8x128xi32> to vector<8x128xf32>
    %c0_1 = arith.constant 0 : index
    %c0_2 = arith.constant 0 : index
    %c0_3 = arith.constant 0 : index
    %8 = vector.load %arg2[%c0_1, %c0_2, %c0_3] : memref<4x128x128xf32, #tpu.memory_space<vmem>>, vector<1x128x128xf32>
    %9 = vector.shape_cast %8 : vector<1x128x128xf32> to vector<128x128xf32>
    %cst_4 = arith.constant dense<0.000000e+00> : vector<8x128xf32>
    %10 = tpu.matmul %7, %9, %cst_4 {dimension_numbers = #tpu.dot_dimension_numbers<[1], [0], [0], [1], [0, 0, 1, 1], [], []>} : vector<8x128xf32>, vector<128x128xf32>, vector<8x128xf32> -> vector<8x128xf32>
    %11 = arith.addf %2, %10 : vector<8x128xf32>
    %12 = vector.extract_strided_slice %0 {offsets = [0, 1], sizes = [8, 1], strides = [1, 1]} : vector<8x4xi32> to vector<8x1xi32>
    %13 = vector.broadcast %12 : vector<8x1xi32> to vector<8x128xi32>
    %14 = arith.cmpi eq, %13, %1 : vector<8x128xi32>
    %15 = arith.extui %14 : vector<8x128xi1> to vector<8x128xi32>
    %16 = arith.sitofp %15 : vector<8x128xi32> to vector<8x128xf32>
    %c1 = arith.constant 1 : index
    %c0_5 = arith.constant 0 : index
    %c0_6 = arith.constant 0 : index
    %17 = vector.load %arg2[%c1, %c0_5, %c0_6] : memref<4x128x128xf32, #tpu.memory_space<vmem>>, vector<1x128x128xf32>
    %18 = vector.shape_cast %17 : vector<1x128x128xf32> to vector<128x128xf32>
    %cst_7 = arith.constant dense<0.000000e+00> : vector<8x128xf32>
    %19 = tpu.matmul %16, %18, %cst_7 {dimension_numbers = #tpu.dot_dimension_numbers<[1], [0], [0], [1], [0, 0, 1, 1], [], []>} : vector<8x128xf32>, vector<128x128xf32>, vector<8x128xf32> -> vector<8x128xf32>
    %20 = arith.addf %11, %19 : vector<8x128xf32>
    %21 = vector.extract_strided_slice %0 {offsets = [0, 2], sizes = [8, 1], strides = [1, 1]} : vector<8x4xi32> to vector<8x1xi32>
    %22 = vector.broadcast %21 : vector<8x1xi32> to vector<8x128xi32>
    %23 = arith.cmpi eq, %22, %1 : vector<8x128xi32>
    %24 = arith.extui %23 : vector<8x128xi1> to vector<8x128xi32>
    %25 = arith.sitofp %24 : vector<8x128xi32> to vector<8x128xf32>
    %c2 = arith.constant 2 : index
    %c0_8 = arith.constant 0 : index
    %c0_9 = arith.constant 0 : index
    %26 = vector.load %arg2[%c2, %c0_8, %c0_9] : memref<4x128x128xf32, #tpu.memory_space<vmem>>, vector<1x128x128xf32>
    %27 = vector.shape_cast %26 : vector<1x128x128xf32> to vector<128x128xf32>
    %cst_10 = arith.constant dense<0.000000e+00> : vector<8x128xf32>
    %28 = tpu.matmul %25, %27, %cst_10 {dimension_numbers = #tpu.dot_dimension_numbers<[1], [0], [0], [1], [0, 0, 1, 1], [], []>} : vector<8x128xf32>, vector<128x128xf32>, vector<8x128xf32> -> vector<8x128xf32>
    %29 = arith.addf %20, %28 : vector<8x128xf32>
    %30 = vector.extract_strided_slice %0 {offsets = [0, 3], sizes = [8, 1], strides = [1, 1]} : vector<8x4xi32> to vector<8x1xi32>
    %31 = vector.broadcast %30 : vector<8x1xi32> to vector<8x128xi32>
    %32 = arith.cmpi eq, %31, %1 : vector<8x128xi32>
    %33 = arith.extui %32 : vector<8x128xi1> to vector<8x128xi32>
    %34 = arith.sitofp %33 : vector<8x128xi32> to vector<8x128xf32>
    %c3 = arith.constant 3 : index
    %c0_11 = arith.constant 0 : index
    %c0_12 = arith.constant 0 : index
    %35 = vector.load %arg2[%c3, %c0_11, %c0_12] : memref<4x128x128xf32, #tpu.memory_space<vmem>>, vector<1x128x128xf32>
    %36 = vector.shape_cast %35 : vector<1x128x128xf32> to vector<128x128xf32>
    %cst_13 = arith.constant dense<0.000000e+00> : vector<8x128xf32>
    %37 = tpu.matmul %34, %36, %cst_13 {dimension_numbers = #tpu.dot_dimension_numbers<[1], [0], [0], [1], [0, 0, 1, 1], [], []>} : vector<8x128xf32>, vector<128x128xf32>, vector<8x128xf32> -> vector<8x128xf32>
    %38 = arith.addf %29, %37 : vector<8x128xf32>
    %c0_14 = arith.constant 0 : index
    %c0_15 = arith.constant 0 : index
    %39 = vector.load %arg3[%c0_14, %c0_15] : memref<1x128xf32, #tpu.memory_space<vmem>>, vector<1x128xf32>
    %40 = vector.broadcast %39 : vector<1x128xf32> to vector<8x128xf32>
    %41 = arith.addf %38, %40 : vector<8x128xf32>
    %cst_16 = arith.constant 0.000000e+00 : f32
    %42 = vector.broadcast %cst_16 : f32 to vector<8x128xf32>
    %43 = arith.maximumf %41, %42 : vector<8x128xf32>
    %c0_17 = arith.constant 0 : index
    %c0_18 = arith.constant 0 : index
    %44 = vector.load %arg4[%c0_17, %c0_18] : memref<128x128xf32, #tpu.memory_space<vmem>>, vector<128x128xf32>
    %cst_19 = arith.constant dense<0.000000e+00> : vector<8x128xf32>
    %45 = tpu.matmul %43, %44, %cst_19 {dimension_numbers = #tpu.dot_dimension_numbers<[1], [0], [0], [1], [0, 0, 1, 1], [], []>} : vector<8x128xf32>, vector<128x128xf32>, vector<8x128xf32> -> vector<8x128xf32>
    %c0_20 = arith.constant 0 : index
    %c0_21 = arith.constant 0 : index
    %46 = vector.load %arg5[%c0_20, %c0_21] : memref<1x128xf32, #tpu.memory_space<vmem>>, vector<1x128xf32>
    %47 = vector.broadcast %46 : vector<1x128xf32> to vector<8x128xf32>
    %48 = arith.addf %45, %47 : vector<8x128xf32>
    %cst_22 = arith.constant 0.000000e+00 : f32
    %49 = vector.broadcast %cst_22 : f32 to vector<8x128xf32>
    %50 = arith.maximumf %48, %49 : vector<8x128xf32>
    %c0_23 = arith.constant 0 : index
    %c0_24 = arith.constant 0 : index
    %51 = vector.load %arg6[%c0_23, %c0_24] : memref<128x3xf32, #tpu.memory_space<vmem>>, vector<128x3xf32>
    %cst_25 = arith.constant dense<0.000000e+00> : vector<8x3xf32>
    %52 = tpu.matmul %50, %51, %cst_25 {dimension_numbers = #tpu.dot_dimension_numbers<[1], [0], [0], [1], [0, 0, 1, 1], [], []>} : vector<8x128xf32>, vector<128x3xf32>, vector<8x3xf32> -> vector<8x3xf32>
    %c0_26 = arith.constant 0 : index
    %c0_27 = arith.constant 0 : index
    %53 = vector.load %arg7[%c0_26, %c0_27] : memref<1x3xf32, #tpu.memory_space<vmem>>, vector<1x3xf32>
    %54 = vector.broadcast %53 : vector<1x3xf32> to vector<8x3xf32>
    %55 = arith.addf %52, %54 : vector<8x3xf32>
    %c0_28 = arith.constant 0 : index
    %c0_29 = arith.constant 0 : index
    %56 = vector.load %arg8[%c0_28, %c0_29] : memref<8x3xf32, #tpu.memory_space<vmem>>, vector<8x3xf32>
    tpu.vector_store %arg8[%c0_28, %c0_29], %55 {strides = array<i32>} : memref<8x3xf32, #tpu.memory_space<vmem>>, vector<8x3xf32>,
    return
  }
  func.func @transform_0(%arg0: i32) -> (i32, i32) {
    %c0_i32 = arith.constant 0 : i32
    %c0_i32_0 = arith.constant 0 : i32
    return %arg0, %c0_i32 : i32, i32
  }
  func.func @transform_1(%arg0: i32) -> (i32, i32, i32) {
    %c0_i32 = arith.constant 0 : i32
    %c0_i32_0 = arith.constant 0 : i32
    %c0_i32_1 = arith.constant 0 : i32
    %c0_i32_2 = arith.constant 0 : i32
    return %c0_i32, %c0_i32_0, %c0_i32_1 : i32, i32, i32
  }
  func.func @transform_2(%arg0: i32) -> (i32, i32) {
    %c0_i32 = arith.constant 0 : i32
    %c0_i32_0 = arith.constant 0 : i32
    %c0_i32_1 = arith.constant 0 : i32
    return %c0_i32, %c0_i32_0 : i32, i32
  }
  func.func @transform_3(%arg0: i32) -> (i32, i32) {
    %c0_i32 = arith.constant 0 : i32
    %c0_i32_0 = arith.constant 0 : i32
    %c0_i32_1 = arith.constant 0 : i32
    return %c0_i32, %c0_i32_0 : i32, i32
  }
  func.func @transform_4(%arg0: i32) -> (i32, i32) {
    %c0_i32 = arith.constant 0 : i32
    %c0_i32_0 = arith.constant 0 : i32
    %c0_i32_1 = arith.constant 0 : i32
    return %c0_i32, %c0_i32_0 : i32, i32
  }
  func.func @transform_5(%arg0: i32) -> (i32, i32) {
    %c0_i32 = arith.constant 0 : i32
    %c0_i32_0 = arith.constant 0 : i32
    %c0_i32_1 = arith.constant 0 : i32
    return %c0_i32, %c0_i32_0 : i32, i32
  }
  func.func @transform_6(%arg0: i32) -> (i32, i32) {
    %c0_i32 = arith.constant 0 : i32
    %c0_i32_0 = arith.constant 0 : i32
    %c0_i32_1 = arith.constant 0 : i32
    return %c0_i32, %c0_i32_0 : i32, i32
  }
  func.func @transform_7(%arg0: i32) -> (i32, i32) {
    %c0_i32 = arith.constant 0 : i32
    %c0_i32_0 = arith.constant 0 : i32
    return %arg0, %c0_i32 : i32, i32
  }
}

</mosaic_0001>

<bundles_post_ra>
// kernel: tpu_custom_call.1
= control target key start
LH: loop header
LB: loop body
LE: loop exit
PB: predicated region body
PF: predicated region fallthrough
CT: control target
= control target key end

     0   :  { %12 = vsyncpa [#allocation3], 0  ;;  %s361_s27 = smov [#allocation2]   ;;  %s362_s29 = smov 128   ;;  %s523_s0 = inlined_call_operand.vmem [shape: s32[8,4], index: 0, kind: input, shape index: {}]   ;;  %s524_s1 = inlined_call_operand.hbm [shape: f32[4,128,128], index: 1, kind: input, shape index: {}]   ;;  %s525_s2 = inlined_call_operand.vmem [shape: f32[1,128], index: 2, kind: input, shape index: {}]   ;;  %s526_s3 = inlined_call_operand.vmem [shape: f32[128,128], index: 3, kind: input, shape index: {}]   ;;  %s527_s4 = inlined_call_operand.vmem [shape: f32[1,128], index: 4, kind: input, shape index: {}]   ;;  %s528_s5 = inlined_call_operand.vmem [shape: f32[128,3], index: 5, kind: input, shape index: {}]   ;;  %s529_s6 = inlined_call_operand.vmem [shape: f32[1,3], index: 6, kind: input, shape index: {}]   ;;  %s530_s7 = inlined_call_operand.vmem [shape: f32[8,3], index: 7, kind: output, shape index: {}]  }
   0x1   :  { %s19_s26 = sshll.u32 %s524_s1, 4  ;;  %s21_s28 = sshll.u32 %s361_s27, 4  ;;  %s20_s26 = int_to_ptr.hbm [resolvable:$true] %s19_s26  ;;  %s22_s28 = int_to_ptr.vmem [resolvable:$true] %s21_s28 }
   0x2   :  { %s363_s30 = smov 8  }
   0x3   :  { %27 = dma.hbm_to_vmem [thread:$0]  %s20_s26, 8192, %s22_s28, [#allocation3], %s362_s29, %s362_s29, %s363_s30  }
   0x4   :  { %359 = dma.done.wait [#allocation3], 8192  }
   0x5   :  { %360 = vsyncadd [#allocation3], 4294959104  ;;  %v364_v0 = vmov 2   ;;  %v365_v1 = vmov 0   ;;  %v42_v2 = vld [vmem:[%s523_s0] sm:$0xff]  ;;  %v152_v3 = vld [vmem:[#allocation2 + $0x178] sm:$0xff] }
   0x6   :  { %328 = vset.pattern.permute.xlu0 %v364_v0  ;;  %330 = vset.pattern.permute.xlu1 %v365_v1  ;;  %v66_v4 = vld [vmem:[#allocation2 + $0x78] sm:$0xff]  ;;  %v151_v5 = vld [vmem:[#allocation2 + $0x170] sm:$0xff]  ;;  %v150_v7 = vld [vmem:[#allocation2 + $0x168] sm:$0xff]  ;;  %v366_v17 = vmov 1   ;;  %v367_v18 = vmov 3   ;;  %vm305_vm4 = vcmask 23552  }
   0x7   :  { %46 = vperm.xlu1 %330, %v42_v2   ;;  %131 = vperm.xlu0 %328, %v42_v2   ;;  %v65_v6 = vld [vmem:[#allocation2 + $0x70] sm:$0xff]  ;;  %v64_v8 = vld [vmem:[#allocation2 + $0x68] sm:$0xff]  ;;  %v89_v9 = vld [vmem:[#allocation2 + $0xf8] sm:$0xff] }
   0x8   :  { %153 = vmatpush.msra.mxu2 %v152_v3  ;;  %110 = vmatpush.msra.mxu1 %v66_v4  ;;  %v196_v10 = vld [vmem:[#allocation2 + $0x1f8] sm:$0xff]  ;;  %v88_v11 = vld [vmem:[#allocation2 + $0xf0] sm:$0xff]  ;;  %v149_v12 = vld [vmem:[#allocation2 + $0x160] sm:$0xff] }
   0x9   :  { %v63_v13 = vld [vmem:[#allocation2 + $0x60] sm:$0xff]  ;;  %90 = vmatpush.msra.mxu0 %v89_v9  ;;  %197 = vmatpush.msra.mxu3 %v196_v10  ;;  %v195_v14 = vld [vmem:[#allocation2 + $0x1f0] sm:$0xff]  ;;  %v148_v15 = vld [vmem:[#allocation2 + $0x158] sm:$0xff] }
   0xa   :  { %154 = vmatpush.msra.mxu2 %v151_v5  ;;  %111 = vmatpush.msra.mxu1 %v65_v6  ;;  %v62_v16 = vld [vmem:[#allocation2 + $0x58] sm:$0xff]  ;;  %v87_v19 = vld [vmem:[#allocation2 + $0xe8] sm:$0xff]  ;;  %v147_v21 = vld [vmem:[#allocation2 + $0x150] sm:$0xff] }
   0xb   :  { %91 = vmatpush.msra.mxu0 %v88_v11  ;;  %198 = vmatpush.msra.mxu3 %v195_v14  ;;  %v194_v20 = vld [vmem:[#allocation2 + $0x1e8] sm:$0xff]  ;;  %v61_v22 = vld [vmem:[#allocation2 + $0x50] sm:$0xff]  ;;  %v86_v23 = vld [vmem:[#allocation2 + $0xe0] sm:$0xff]  ;;  %v43_v11 = vlaneseq }
   0xc   :  { %155 = vmatpush.msra.mxu2 %v150_v7  ;;  %112 = vmatpush.msra.mxu1 %v64_v8  ;;  %v193_v24 = vld [vmem:[#allocation2 + $0x1e0] sm:$0xff]  ;;  %v146_v25 = vld [vmem:[#allocation2 + $0x148] sm:$0xff]  ;;  %v85_v27 = vld [vmem:[#allocation2 + $0xd8] sm:$0xff] }
   0xd   :  { %92 = vmatpush.msra.mxu0 %v87_v19  ;;  %199 = vmatpush.msra.mxu3 %v194_v20  ;;  %v60_v26 = vld [vmem:[#allocation2 + $0x48] sm:$0xff]  ;;  %v192_v28 = vld [vmem:[#allocation2 + $0x1d8] sm:$0xff]  ;;  %v145_v29 = vld [vmem:[#allocation2 + $0x140] sm:$0xff] }
   0xe   :  { %156 = vmatpush.msra.mxu2 %v149_v12  ;;  %113 = vmatpush.msra.mxu1 %v63_v13  ;;  %v59_v30 = vld [vmem:[#allocation2 + $0x40] sm:$0xff]  ;;  %v84_v31 = vld [vmem:[#allocation2 + $0xd0] sm:$0xff]  ;;  %v144_v33 = vld [vmem:[#allocation2 + $0x138] sm:$0xff]  ;;  %v44_v12 = vand.u32 127, %v43_v11 }
   0xf   :  { %331 = vset.pattern.permute.xlu1 %v366_v17  ;;  %329 = vset.pattern.permute.xlu0 %v367_v18  ;;  %v191_v32 = vld [vmem:[#allocation2 + $0x1d0] sm:$0xff]  ;;  %v58_v34 = vld [vmem:[#allocation2 + $0x38] sm:$0xff]  ;;  %v83_v35 = vld [vmem:[#allocation2 + $0xc8] sm:$0xff] }
  0x10   :  { %68 = vperm.xlu1 %331, %v42_v2   ;;  %175 = vperm.xlu0 %329, %v42_v2   ;;  %v190_v36 = vld [vmem:[#allocation2 + $0x1c8] sm:$0xff]  ;;  %v143_v37 = vld [vmem:[#allocation2 + $0x130] sm:$0xff]  ;;  %v82_v39 = vld [vmem:[#allocation2 + $0xc0] sm:$0xff] }
  0x11   :  { %157 = vmatpush.msra.mxu2 %v148_v15  ;;  %114 = vmatpush.msra.mxu1 %v62_v16  ;;  %v57_v38 = vld [vmem:[#allocation2 + $0x30] sm:$0xff]  ;;  %v189_v40 = vld [vmem:[#allocation2 + $0x1c0] sm:$0xff]  ;;  %v142_v41 = vld [vmem:[#allocation2 + $0x128] sm:$0xff]  ;;  %v368_v15 = vmov 1.0  }
  0x12   :  { %93 = vmatpush.msra.mxu0 %v86_v23  ;;  %200 = vmatpush.msra.mxu3 %v193_v24  ;;  %v56_v42 = vld [vmem:[#allocation2 + $0x28] sm:$0xff]  ;;  %v81_v43 = vld [vmem:[#allocation2 + $0xb8] sm:$0xff]  ;;  %v141_v45 = vld [vmem:[#allocation2 + $0x120] sm:$0xff] }
  0x13   :  { %158 = vmatpush.msra.mxu2 %v147_v21  ;;  %115 = vmatpush.msra.mxu1 %v61_v22  ;;  %v188_v44 = vld [vmem:[#allocation2 + $0x1b8] sm:$0xff]  ;;  %v55_v46 = vld [vmem:[#allocation2 + $0x20] sm:$0xff]  ;;  %v80_v47 = vld [vmem:[#allocation2 + $0xb0] sm:$0xff] }
  0x14   :  { %94 = vmatpush.msra.mxu0 %v85_v27  ;;  %201 = vmatpush.msra.mxu3 %v192_v28  ;;  %v187_v48 = vld [vmem:[#allocation2 + $0x1b0] sm:$0xff]  ;;  %v140_v49 = vld [vmem:[#allocation2 + $0x118] sm:$0xff]  ;;  %v79_v51 = vld [vmem:[#allocation2 + $0xa8] sm:$0xff] }
  0x15   :  { %159 = vmatpush.msra.mxu2 %v146_v25  ;;  %116 = vmatpush.msra.mxu1 %v60_v26  ;;  %v54_v50 = vld [vmem:[#allocation2 + $0x18] sm:$0xff]  ;;  %v186_v52 = vld [vmem:[#allocation2 + $0x1a8] sm:$0xff]  ;;  %v139_v53 = vld [vmem:[#allocation2 + $0x110] sm:$0xff] }
  0x16   :  { %95 = vmatpush.msra.mxu0 %v84_v31  ;;  %202 = vmatpush.msra.mxu3 %v191_v32  ;;  %v53_v54 = vld [vmem:[#allocation2 + $0x10] sm:$0xff]  ;;  %v138_v55 = vld [vmem:[#allocation2 + $0x108] sm:$0xff]  ;;  %v137_v57 = vld [vmem:[#allocation2 + $0x100] sm:$0xff] }
  0x17   :  { %160 = vmatpush.msra.mxu2 %v145_v29  ;;  %117 = vmatpush.msra.mxu1 %v59_v30  ;;  %v52_v56 = vld [vmem:[#allocation2 + $0x8] sm:$0xff]  ;;  %v78_v58 = vld [vmem:[#allocation2 + $0xa0] sm:$0xff]  ;;  %v77_v61 = vld [vmem:[#allocation2 + $0x98] sm:$0xff] }
  0x18   :  { %96 = vmatpush.msra.mxu0 %v83_v35  ;;  %203 = vmatpush.msra.mxu3 %v190_v36  ;;  %v185_v59 = vld [vmem:[#allocation2 + $0x1a0] sm:$0xff]  ;;  %v184_v62 = vld [vmem:[#allocation2 + $0x198] sm:$0xff]  ;;  %v76_v63 = vld [vmem:[#allocation2 + $0x90] sm:$0xff] }
  0x19   :  { %161 = vmatpush.msra.mxu2 %v144_v33  ;;  %118 = vmatpush.msra.mxu1 %v58_v34  ;;  %v51_v60 = vld [vmem:[#allocation2] sm:$0xff]  ;;  %v183_v0 = vld [vmem:[#allocation2 + $0x190] sm:$0xff]  ;;  %v75_v1 = vld [vmem:[#allocation2 + $0x88] sm:$0xff] }
  0x1a   :  { %97 = vmatpush.msra.mxu0 %v82_v39  ;;  %204 = vmatpush.msra.mxu3 %v189_v40  ;;  %v182_v2 = vld [vmem:[#allocation2 + $0x188] sm:$0xff]  ;;  %v74_v3 = vld [vmem:[#allocation2 + $0x80] sm:$0xff]  ;;  %v239_v5 = vld [vmem:[%s526_s3 + $0x78] sm:$0xff] }
  0x1b   :  { %162 = vmatpush.msra.mxu2 %v143_v37  ;;  %119 = vmatpush.msra.mxu1 %v57_v38  ;;  %v181_v4 = vld [vmem:[#allocation2 + $0x180] sm:$0xff]  ;;  %v238_v6 = vld [vmem:[%s526_s3 + $0x70] sm:$0xff]  ;;  %v237_v7 = vld [vmem:[%s526_s3 + $0x68] sm:$0xff] }
  0x1c   :  { %98 = vmatpush.msra.mxu0 %v81_v43  ;;  %205 = vmatpush.msra.mxu3 %v188_v44  ;;  %v236_v8 = vld [vmem:[%s526_s3 + $0x60] sm:$0xff]  ;;  %v235_v9 = vld [vmem:[%s526_s3 + $0x58] sm:$0xff]  ;;  %v234_v10 = vld [vmem:[%s526_s3 + $0x50] sm:$0xff] }
  0x1d   :  { %163 = vmatpush.msra.mxu2 %v142_v41  ;;  %120 = vmatpush.msra.mxu1 %v56_v42  ;;  %v233_v18 = vld [vmem:[%s526_s3 + $0x48] sm:$0xff]  ;;  %v232_v19 = vld [vmem:[%s526_s3 + $0x40] sm:$0xff]  ;;  %v231_v20 = vld [vmem:[%s526_s3 + $0x38] sm:$0xff] }
  0x1e   :  { %99 = vmatpush.msra.mxu0 %v80_v47  ;;  %206 = vmatpush.msra.mxu3 %v187_v48  ;;  %v230_v21 = vld [vmem:[%s526_s3 + $0x30] sm:$0xff]  ;;  %v229_v22 = vld [vmem:[%s526_s3 + $0x28] sm:$0xff]  ;;  %v228_v23 = vld [vmem:[%s526_s3 + $0x20] sm:$0xff] }
  0x1f   :  { %164 = vmatpush.msra.mxu2 %v141_v45  ;;  %121 = vmatpush.msra.mxu1 %v55_v46  ;;  %v227_v24 = vld [vmem:[%s526_s3 + $0x18] sm:$0xff]  ;;  %v226_v25 = vld [vmem:[%s526_s3 + $0x10] sm:$0xff]  ;;  %v225_v26 = vld [vmem:[%s526_s3 + $0x8] sm:$0xff] }
  0x20   :  { %100 = vmatpush.msra.mxu0 %v79_v51  ;;  %207 = vmatpush.msra.mxu3 %v186_v52  ;;  %v224_v27 = vld [vmem:[%s526_s3] sm:$0xff]  ;;  %v280_v28 = vld [vmem:[%s528_s5 + $0x78] sm:$0xff]  ;;  %v279_v29 = vld [vmem:[%s528_s5 + $0x70] sm:$0xff] }
  0x21   :  { %165 = vmatpush.msra.mxu2 %v140_v49  ;;  %122 = vmatpush.msra.mxu1 %v54_v50  ;;  %v278_v30 = vld [vmem:[%s528_s5 + $0x68] sm:$0xff]  ;;  %v277_v31 = vld [vmem:[%s528_s5 + $0x60] sm:$0xff]  ;;  %v276_v32 = vld [vmem:[%s528_s5 + $0x58] sm:$0xff] }
  0x22   :  { %101 = vmatpush.msra.mxu0 %v78_v58  ;;  %208 = vmatpush.msra.mxu3 %v185_v59  ;;  %v275_v33 = vld [vmem:[%s528_s5 + $0x50] sm:$0xff]  ;;  %v274_v34 = vld [vmem:[%s528_s5 + $0x48] sm:$0xff]  ;;  %v273_v35 = vld [vmem:[%s528_s5 + $0x40] sm:$0xff] }
  0x23   :  { %166 = vmatpush.msra.mxu2 %v139_v53  ;;  %123 = vmatpush.msra.mxu1 %v53_v54  ;;  %v272_v36 = vld [vmem:[%s528_s5 + $0x38] sm:$0xff]  ;;  %v271_v37 = vld [vmem:[%s528_s5 + $0x30] sm:$0xff]  ;;  %v270_v38 = vld [vmem:[%s528_s5 + $0x28] sm:$0xff] }
  0x24   :  { %102 = vmatpush.msra.mxu0 %v77_v61  ;;  %209 = vmatpush.msra.mxu3 %v184_v62  ;;  %v269_v42 = vld [vmem:[%s528_s5 + $0x20] sm:$0xff]  ;;  %v268_v43 = vld [vmem:[%s528_s5 + $0x18] sm:$0xff]  ;;  %v267_v51 = vld [vmem:[%s528_s5 + $0x10] sm:$0xff] }
  0x25   :  { %167 = vmatpush.msra.mxu2 %v138_v55  ;;  %124 = vmatpush.msra.mxu1 %v52_v56  ;;  %v332_v46 = vld [vmem:[%s525_s2] ss:$0 sm:$0xff]  ;;  %v266_v52 = vld [vmem:[%s528_s5 + $0x8] sm:$0xff] }
  0x26   :  { %103 = vmatpush.msra.mxu0 %v76_v63  ;;  %210 = vmatpush.msra.mxu3 %v183_v0  ;;  %v265_v53 = vld [vmem:[%s528_s5] sm:$0xff] }
  0x27   :  { %168 = vmatpush.msra.mxu2 %v137_v57  ;;  %125 = vmatpush.msra.mxu1 %v51_v60  ;;  %v333_v54 = vld [vmem:[%s527_s4] ss:$0 sm:$0xff] }
  0x28   :  { %104 = vmatpush.msra.mxu0 %v75_v1  ;;  %211 = vmatpush.msra.mxu3 %v182_v2  ;;  %v334_v58 = vld [vmem:[%s529_s6] ss:$0 sm:$0xff] }
  0x29   :  { %285 = vmatpush.msrb.mxu1 %v280_v28 }
  0x2a   :  { %105 = vmatpush.msra.mxu0 %v74_v3  ;;  %212 = vmatpush.msra.mxu3 %v181_v4 }
  0x2b   :  { %286 = vmatpush.msrb.mxu1 %v279_v29 }
  0x2c   :  { %244 = vmatpush.msrb.mxu0 %v239_v5 }
  0x2d   :  { %287 = vmatpush.msrb.mxu1 %v278_v30 }
  0x2e   :  { %245 = vmatpush.msrb.mxu0 %v238_v6 }
  0x2f   :  { %288 = vmatpush.msrb.mxu1 %v277_v31 }
  0x30   :  { %246 = vmatpush.msrb.mxu0 %v237_v7 }
  0x31   :  { %289 = vmatpush.msrb.mxu1 %v276_v32 }
  0x32   :  { %247 = vmatpush.msrb.mxu0 %v236_v8 }
  0x33   :  { %290 = vmatpush.msrb.mxu1 %v275_v33 }
  0x34   :  { %248 = vmatpush.msrb.mxu0 %v235_v9 }
  0x35   :  { %291 = vmatpush.msrb.mxu1 %v274_v34 }
  0x36   :  { %249 = vmatpush.msrb.mxu0 %v234_v10 }
  0x37   :  { %292 = vmatpush.msrb.mxu1 %v273_v35 }
  0x38   :  { %250 = vmatpush.msrb.mxu0 %v233_v18 }
  0x39   :  { %293 = vmatpush.msrb.mxu1 %v272_v36 }
  0x3a   :  { %251 = vmatpush.msrb.mxu0 %v232_v19 }
  0x3b   :  { %294 = vmatpush.msrb.mxu1 %v271_v37 }
  0x3c   :  { %252 = vmatpush.msrb.mxu0 %v231_v20 }
  0x3d   :  { %295 = vmatpush.msrb.mxu1 %v270_v38 }
  0x3e   :  { %253 = vmatpush.msrb.mxu0 %v230_v21 }
  0x3f   :  { %296 = vmatpush.msrb.mxu1 %v269_v42 }
  0x40   :  { %254 = vmatpush.msrb.mxu0 %v229_v22 }
  0x41   :  { %297 = vmatpush.msrb.mxu1 %v268_v43 }
  0x42   :  { %255 = vmatpush.msrb.mxu0 %v228_v23 }
  0x43   :  { %298 = vmatpush.msrb.mxu1 %v267_v51 }
  0x44   :  { %256 = vmatpush.msrb.mxu0 %v227_v24 }
  0x45   :  { %299 = vmatpush.msrb.mxu1 %v266_v52 }
  0x46   :  { %257 = vmatpush.msrb.mxu0 %v226_v25 }
  0x47   :  { %300 = vmatpush.msrb.mxu1 %v265_v53 }
  0x48   :  { %258 = vmatpush.msrb.mxu0 %v225_v26 }
  0x4a   :  { %259 = vmatpush.msrb.mxu0 %v224_v27 }
  0x79   :  { %v132_v13 = vpop.permute.xlu0 %131  ;;  %v47_v14 = vpop.permute.xlu1 %46 }
  0x7a   :  { %vm133_vm0 = vcmp.eq.s32.totalorder %v132_v13, %v44_v12  ;;  %vm48_vm1 = vcmp.eq.s32.totalorder %v47_v14, %v44_v12 }
  0x7b   :  { %317 = vmatmul.msk.f32.vlgmr.msra.gmra.mxu2 %vm133_vm0, %v368_v15  ;;  %315 = vmatmul.msk.f32.vlgmr.msra.gmra.mxu1 %vm48_vm1, %v368_v15 }
  0x82   :  { %v69_v16 = vpop.permute.xlu1 %68  ;;  %v176_v17 = vpop.permute.xlu0 %175 }
  0x83   :  { %vm70_vm2 = vcmp.eq.s32.totalorder %v69_v16, %v44_v12  ;;  %vm177_vm3 = vcmp.eq.s32.totalorder %v176_v17, %v44_v12 }
  0x84   :  { %314 = vmatmul.msk.f32.vlgmr.msra.gmra.mxu0 %vm70_vm2, %v368_v15  ;;  %319 = vmatmul.msk.f32.vlgmr.msra.gmra.mxu3 %vm177_vm3, %v368_v15 }
  0xf8   :  { %v127_v39 = vpop.f32.mrf.mxu1 }
  0xfe   :  { %v170_v44 = vpop.f32.mrf.mxu2 }
 0x101   :  { %v107_v40 = vpop.f32.mrf.mxu0 }
 0x102   :  { %v128_v41 = vadd.f32 %v127_v39, %v107_v40 }
 0x104   :  { %v173_v45 = vadd.f32 %v170_v44, %v128_v41 }
 0x107   :  { %v214_v47 = vpop.f32.mrf.mxu3 }
 0x108   :  { %v217_v48 = vadd.f32 %v214_v47, %v173_v45 }
 0x10a   :  { %v222_v49 = vadd.f32 %v332_v46, %v217_v48 }
 0x10c   :  { %v223_v50 = vmax.f32 %v222_v49, 0.0 }
 0x10e   :  { %260 = vmatmul.f32.vlgmr.msrb.gmra.mxu0 %v223_v50 }
 0x18b   :  { %v261_v55 = vpop.f32.mrf.mxu0 }
 0x18c   :  { %v262_v56 = vadd.f32 %v333_v54, %v261_v55 }
 0x18e   :  { %v264_v57 = vmax.f32 %v262_v56, 0.0 }
 0x190   :  { %301 = vmatmul.f32.vlgmr.msrb.gmra.mxu1 %v264_v57 }
 0x20d   :  { %v302_v59 = vpop.f32.mrf.mxu1 }
 0x20e   :  { %v303_v60 = vadd.f32 %v334_v58, %v302_v59 }
 0x210   :  { %306 = vst.msk [vmem:[%s530_s7] sm:$0xff] %vm305_vm4, %v303_v60 }
 0x211   :  { %311 = vsyncpa [#allocation3], 1 }

</bundles_post_ra>
